<compile_context>
chip_gen: v5e
topology: v5e:2x2
jax: 0.10.0
libtpu: 0.0.40
codegen_flags: <defaults>
</compile_context>

<pallas_src>
import math

import jax
import jax.numpy as jnp
from jax.experimental import pallas as pl
from jax.experimental.pallas import tpu as pltpu


def _round_up(x, m):
    return (x + m - 1) // m * m


def _tpu_budget():
    """Best-effort (vmem_capacity_bytes, num_tensorcores_per_chip)."""
    kind = ""
    try:
        kind = jax.devices()[0].device_kind.lower()
    except Exception:
        pass
    is_v7 = ("v7" in kind) or ("7x" in kind)
    try:
        vmem_cap = int(pltpu.get_tpu_info().vmem_capacity_bytes)
    except Exception:
        # v5e / v6e have 128 MiB of VMEM per TensorCore; v7x has 64 MiB.
        vmem_cap = (64 << 20) if is_v7 else (128 << 20)
    num_tc = 2 if is_v7 else 1
    return vmem_cap, num_tc


def _pick_batch_tile(N, per_image_bytes, num_tc, budget_bytes):
    """Images per grid step: fill ~budget_bytes, keep >= num_tc grid steps when
    the chip has 2 TensorCores, keep N % Nb == 0, bound the static unroll."""
    nb = int(max(1, min(N, budget_bytes // max(per_image_bytes, 1))))
    if num_tc >= 2 and N >= 2:
        nb = min(nb, max(1, N // num_tc))
    nb = min(nb, 32)          # bound trace-time unroll of the tap-copy loop
    nb = max(nb, 1)
    while N % nb:
        nb -= 1
    return nb


def _make_equal_conv2d_kernel(Nb, Cpad, KH, KW, Wp, Sp):
    """Sp = round_up(Ho*Wp, 128): per-image full-width output slab (the last
    KW-1 columns of each row plus the Sp-S lane padding are garbage and are
    dropped by the wrapper)."""
    KK = KH * KW

    def kernel(x_ref, w_ref, b_ref, o_ref, p_ref):
        # x_ref : (Nb, Cpad, Lf)      flat zero-padded images (wrapper-padded)
        # w_ref : (OC, KK*Cpad)       EqualLR-scaled packed weight
        # b_ref : (OC, 1)             bias (f32)
        # o_ref : (Nb, OC, Sp)        full-width output slabs
        # p_ref : (KK*Cpad, Nb*Sp)    patch matrix scratch (fully rewritten)

        # Build the patch matrix.  Every write is a full (Cpad x Sp) slab at an
        # (8,128)-aligned offset; only the *read* is lane-shifted (cheap XLU
        # rotate).  Tap (kh,kw) of the flat image is a contiguous shift by
        # kh*Wp + kw — no 2D window slices or relayouts.
        for nb in range(Nb):
            base = nb * Sp
            for kh in range(KH):
                for kw in range(KW):
                    t = kh * KW + kw
                    off = kh * Wp + kw
                    p_ref[t * Cpad:(t + 1) * Cpad, base:base + Sp] = (
                        x_ref[nb, :, off:off + Sp].astype(p_ref.dtype))

        # One MXU GEMM for the whole batch tile, f32 accumulation, one bias add.
        res = jnp.dot(w_ref[...], p_ref[...],
                      preferred_element_type=jnp.float32)
        res = res + b_ref[...].astype(jnp.float32)          # (OC, Nb*Sp)

        # Nb lane-aligned full-slab stores (no per-row masked compaction).
        for nb in range(Nb):
            o_ref[nb, :, :] = res[:, nb * Sp:(nb + 1) * Sp].astype(o_ref.dtype)

    return kernel


def equal_conv2d(x_nchw, weight_oihw, bias, *, padding=1, compute_dtype=None):
    """Forward of EqualConv2d: conv2d(x, weight * sqrt(2 / fan_in), bias)."""
    N, C, H, W = x_nchw.shape
    OC, Cw, KH, KW = weight_oihw.shape
    assert Cw == C

    pad = int(padding)
    Hp, Wp = H + 2 * pad, W + 2 * pad
    Ho, Wo = Hp - KH + 1, Wp - KW + 1                 # stride = 1
    assert Ho > 0 and Wo > 0

    cdt = jnp.float32 if compute_dtype is None else jnp.dtype(compute_dtype)
    csz = jnp.dtype(cdt).itemsize
    osz = jnp.dtype(x_nchw.dtype).itemsize

    sub = 8 if csz >= 4 else (32 // csz)              # sublane packing of cdt
    Cpad = _round_up(C, sub)
    KK = KH * KW
    KKCp = KK * Cpad

    S = Ho * Wp                                       # full-width output rows
    Sp = _round_up(S, 128)                            # lane-aligned slab width
    max_off = (KH - 1) * Wp + (KW - 1)                # largest tap shift
    Lf = max_off + Sp                                 # flat image + read slack

    # EqualLR.compute_weight: fan_in = weight.size(1) * weight[0][0].numel().
    scale = math.sqrt(2.0 / (C * KH * KW))
    w = weight_oihw.astype(jnp.float32) * scale                    # (OC,C,KH,KW)
    w = jnp.transpose(w, (0, 2, 3, 1))                             # (OC,KH,KW,C)
    w = jnp.pad(w, ((0, 0), (0, 0), (0, 0), (0, Cpad - C)))        # zero taps
    w_packed = w.reshape(OC, KKCp).astype(cdt)                     # (OC,KK*Cpad)
    b2 = bias.astype(jnp.float32).reshape(OC, 1)

    # One fused XLA pad: spatial halo + channel pad + flatten + tap-read slack.
    x_p = jnp.pad(x_nchw, ((0, 0), (0, Cpad - C), (pad, pad), (pad, pad)))
    x_flat = x_p.reshape(N, Cpad, Hp * Wp)
    x_flat = jnp.pad(x_flat, ((0, 0), (0, 0), (0, Lf - Hp * Wp))).astype(cdt)

    vmem_cap, num_tc = _tpu_budget()
    per_image = (2 * Cpad * Lf * csz                         # x block (2x buf)
                 + 2 * _round_up(OC, 8) * Sp * osz           # out block (2x buf)
                 + KKCp * Sp * csz)                          # patch scratch
    const = 2 * (_round_up(OC, 8) * _round_up(KKCp, 128) * csz
                 + _round_up(OC, 8) * 128 * 4)               # weight + bias
    if per_image + const > int(vmem_cap * 0.75):
        # TODO(synk): Ho-tiled variant needed for images this large.
        raise NotImplementedError("image too large for single-image VMEM tiling")
    budget = min(16 << 20, int(vmem_cap * 0.4))
    Nb = _pick_batch_tile(N, per_image, num_tc, max(budget - const, per_image))
    grid = (N // Nb,)

    est = Nb * per_image + const
    vmem_limit = max(int(est * 1.5) + (2 << 20), 4 << 20)
    vmem_limit = min(vmem_limit, int(vmem_cap * 0.75))

    out = pl.pallas_call(
        _make_equal_conv2d_kernel(Nb, Cpad, KH, KW, Wp, Sp),
        out_shape=jax.ShapeDtypeStruct((N, OC, Sp), x_nchw.dtype),
        grid=grid,
        in_specs=[
            pl.BlockSpec((Nb, Cpad, Lf), lambda n: (n, 0, 0)),
            pl.BlockSpec((OC, KKCp), lambda n: (0, 0)),
            pl.BlockSpec((OC, 1), lambda n: (0, 0)),
        ],
        out_specs=pl.BlockSpec((Nb, OC, Sp), lambda n: (n, 0, 0)),
        scratch_shapes=[pltpu.VMEM((KKCp, Nb * Sp), cdt)],
        compiler_params=pltpu.CompilerParams(
            dimension_semantics=("parallel",),
            vmem_limit_bytes=vmem_limit),
    )(x_flat, w_packed, b2)

    # Drop the Sp-S lane padding and the KW-1 garbage columns per full-width
    # row in one fused XLA slice + reshape (free compared to in-kernel masked
    # compaction stores).
    out = out[:, :, :S].reshape(N, OC, Ho, Wp)[:, :, :, :Wo]
    return out


if __name__ == "__main__":
    key = jax.random.PRNGKey(0)
    kx, kw = jax.random.split(key)

    # EqualConv2d(in_channels=4, out_channels=8, kernel_size=3, padding=1)
    N, C, H, W = 2, 4, 16, 16
    OC, K, PAD = 8, 3, 1

    x = jax.random.normal(kx, (N, C, H, W), dtype=jnp.float32)
    # __init__: conv.weight.data.normal_(), conv.bias.data.zero_()
    weight = jax.random.normal(kw, (OC, C, K, K), dtype=jnp.float32)
    bias = jnp.zeros((OC,), dtype=jnp.float32)

    out = jax.block_until_ready(equal_conv2d(x, weight, bias, padding=PAD))

    # Reference: XLA conv with the same EqualLR weight scaling.
    scale = math.sqrt(2.0 / (C * K * K))
    ref = jax.lax.conv_general_dilated(
        x, weight * scale, window_strides=(1, 1),
        padding=((PAD, PAD), (PAD, PAD)),
        dimension_numbers=("NCHW", "OIHW", "NCHW"),
    ) + bias[None, :, None, None]

    assert out.shape == (N, OC, H, W), out.shape
    err = float(jnp.max(jnp.abs(out - ref)))
    assert err < 1e-4, err

    print("KERNEL_OK")
</pallas_src>

<mosaic_0001>
module attributes {stable_mosaic.version = 11 : i64} {
  func.func @kernel(%arg0: i32, %arg1: memref<2x8x422xf32, #tpu.memory_space<vmem>>, %arg2: memref<8x72xf32, #tpu.memory_space<vmem>>, %arg3: memref<8x1xf32, #tpu.memory_space<vmem>>, %arg4: memref<2x8x384xf32, #tpu.memory_space<vmem>>, %arg5: memref<72x768xf32, #tpu.memory_space<vmem>>) attributes {dimension_semantics = [#tpu.dimension_semantics<parallel>], iteration_bounds = array<i64: 1>, scalar_prefetch = 0 : i64, scratch_operands = 1 : i64, tpu.core_type = #tpu.core_type<tc>, window_params = [{transform_indices = @transform_0, window_bounds = array<i64: 2, 8, 422>}, {pipeline_mode = #tpu.pipeline_mode<synchronous>, transform_indices = @transform_1, window_bounds = array<i64: 8, 72>}, {pipeline_mode = #tpu.pipeline_mode<synchronous>, transform_indices = @transform_2, window_bounds = array<i64: 8, 1>}, {transform_indices = @transform_3, window_bounds = array<i64: 2, 8, 384>}]} {
    %c0 = arith.constant 0 : index
    %c0_0 = arith.constant 0 : index
    %c0_1 = arith.constant 0 : index
    %0 = vector.load %arg1[%c0, %c0_0, %c0_1] : memref<2x8x422xf32, #tpu.memory_space<vmem>>, vector<1x8x384xf32>
    %1 = vector.shape_cast %0 : vector<1x8x384xf32> to vector<8x384xf32>
    %c0_2 = arith.constant 0 : index
    %c0_3 = arith.constant 0 : index
    %2 = vector.load %arg5[%c0_2, %c0_3] : memref<72x768xf32, #tpu.memory_space<vmem>>, vector<8x384xf32>
    tpu.vector_store %arg5[%c0_2, %c0_3], %1 {strides = array<i32>} : memref<72x768xf32, #tpu.memory_space<vmem>>, vector<8x384xf32>,
    %c0_4 = arith.constant 0 : index
    %c0_5 = arith.constant 0 : index
    %c1 = arith.constant 1 : index
    %3 = vector.load %arg1[%c0_4, %c0_5, %c1] : memref<2x8x422xf32, #tpu.memory_space<vmem>>, vector<1x8x384xf32>
    %4 = vector.shape_cast %3 : vector<1x8x384xf32> to vector<8x384xf32>
    %c8 = arith.constant 8 : index
    %c0_6 = arith.constant 0 : index
    %5 = vector.load %arg5[%c8, %c0_6] : memref<72x768xf32, #tpu.memory_space<vmem>>, vector<8x384xf32>
    tpu.vector_store %arg5[%c8, %c0_6], %4 {strides = array<i32>} : memref<72x768xf32, #tpu.memory_space<vmem>>, vector<8x384xf32>,
    %c0_7 = arith.constant 0 : index
    %c0_8 = arith.constant 0 : index
    %c2 = arith.constant 2 : index
    %6 = vector.load %arg1[%c0_7, %c0_8, %c2] : memref<2x8x422xf32, #tpu.memory_space<vmem>>, vector<1x8x384xf32>
    %7 = vector.shape_cast %6 : vector<1x8x384xf32> to vector<8x384xf32>
    %c16 = arith.constant 16 : index
    %c0_9 = arith.constant 0 : index
    %8 = vector.load %arg5[%c16, %c0_9] : memref<72x768xf32, #tpu.memory_space<vmem>>, vector<8x384xf32>
    tpu.vector_store %arg5[%c16, %c0_9], %7 {strides = array<i32>} : memref<72x768xf32, #tpu.memory_space<vmem>>, vector<8x384xf32>,
    %c0_10 = arith.constant 0 : index
    %c0_11 = arith.constant 0 : index
    %c18 = arith.constant 18 : index
    %9 = vector.load %arg1[%c0_10, %c0_11, %c18] : memref<2x8x422xf32, #tpu.memory_space<vmem>>, vector<1x8x384xf32>
    %10 = vector.shape_cast %9 : vector<1x8x384xf32> to vector<8x384xf32>
    %c24 = arith.constant 24 : index
    %c0_12 = arith.constant 0 : index
    %11 = vector.load %arg5[%c24, %c0_12] : memref<72x768xf32, #tpu.memory_space<vmem>>, vector<8x384xf32>
    tpu.vector_store %arg5[%c24, %c0_12], %10 {strides = array<i32>} : memref<72x768xf32, #tpu.memory_space<vmem>>, vector<8x384xf32>,
    %c0_13 = arith.constant 0 : index
    %c0_14 = arith.constant 0 : index
    %c19 = arith.constant 19 : index
    %12 = vector.load %arg1[%c0_13, %c0_14, %c19] : memref<2x8x422xf32, #tpu.memory_space<vmem>>, vector<1x8x384xf32>
    %13 = vector.shape_cast %12 : vector<1x8x384xf32> to vector<8x384xf32>
    %c32 = arith.constant 32 : index
    %c0_15 = arith.constant 0 : index
    %14 = vector.load %arg5[%c32, %c0_15] : memref<72x768xf32, #tpu.memory_space<vmem>>, vector<8x384xf32>
    tpu.vector_store %arg5[%c32, %c0_15], %13 {strides = array<i32>} : memref<72x768xf32, #tpu.memory_space<vmem>>, vector<8x384xf32>,
    %c0_16 = arith.constant 0 : index
    %c0_17 = arith.constant 0 : index
    %c20 = arith.constant 20 : index
    %15 = vector.load %arg1[%c0_16, %c0_17, %c20] : memref<2x8x422xf32, #tpu.memory_space<vmem>>, vector<1x8x384xf32>
    %16 = vector.shape_cast %15 : vector<1x8x384xf32> to vector<8x384xf32>
    %c40 = arith.constant 40 : index
    %c0_18 = arith.constant 0 : index
    %17 = vector.load %arg5[%c40, %c0_18] : memref<72x768xf32, #tpu.memory_space<vmem>>, vector<8x384xf32>
    tpu.vector_store %arg5[%c40, %c0_18], %16 {strides = array<i32>} : memref<72x768xf32, #tpu.memory_space<vmem>>, vector<8x384xf32>,
    %c0_19 = arith.constant 0 : index
    %c0_20 = arith.constant 0 : index
    %c36 = arith.constant 36 : index
    %18 = vector.load %arg1[%c0_19, %c0_20, %c36] : memref<2x8x422xf32, #tpu.memory_space<vmem>>, vector<1x8x384xf32>
    %19 = vector.shape_cast %18 : vector<1x8x384xf32> to vector<8x384xf32>
    %c48 = arith.constant 48 : index
    %c0_21 = arith.constant 0 : index
    %20 = vector.load %arg5[%c48, %c0_21] : memref<72x768xf32, #tpu.memory_space<vmem>>, vector<8x384xf32>
    tpu.vector_store %arg5[%c48, %c0_21], %19 {strides = array<i32>} : memref<72x768xf32, #tpu.memory_space<vmem>>, vector<8x384xf32>,
    %c0_22 = arith.constant 0 : index
    %c0_23 = arith.constant 0 : index
    %c37 = arith.constant 37 : index
    %21 = vector.load %arg1[%c0_22, %c0_23, %c37] : memref<2x8x422xf32, #tpu.memory_space<vmem>>, vector<1x8x384xf32>
    %22 = vector.shape_cast %21 : vector<1x8x384xf32> to vector<8x384xf32>
    %c56 = arith.constant 56 : index
    %c0_24 = arith.constant 0 : index
    %23 = vector.load %arg5[%c56, %c0_24] : memref<72x768xf32, #tpu.memory_space<vmem>>, vector<8x384xf32>
    tpu.vector_store %arg5[%c56, %c0_24], %22 {strides = array<i32>} : memref<72x768xf32, #tpu.memory_space<vmem>>, vector<8x384xf32>,
    %c0_25 = arith.constant 0 : index
    %c0_26 = arith.constant 0 : index
    %c38 = arith.constant 38 : index
    %24 = vector.load %arg1[%c0_25, %c0_26, %c38] : memref<2x8x422xf32, #tpu.memory_space<vmem>>, vector<1x8x384xf32>
    %25 = vector.shape_cast %24 : vector<1x8x384xf32> to vector<8x384xf32>
    %c64 = arith.constant 64 : index
    %c0_27 = arith.constant 0 : index
    %26 = vector.load %arg5[%c64, %c0_27] : memref<72x768xf32, #tpu.memory_space<vmem>>, vector<8x384xf32>
    tpu.vector_store %arg5[%c64, %c0_27], %25 {strides = array<i32>} : memref<72x768xf32, #tpu.memory_space<vmem>>, vector<8x384xf32>,
    %c1_28 = arith.constant 1 : index
    %c0_29 = arith.constant 0 : index
    %c0_30 = arith.constant 0 : index
    %27 = vector.load %arg1[%c1_28, %c0_29, %c0_30] : memref<2x8x422xf32, #tpu.memory_space<vmem>>, vector<1x8x384xf32>
    %28 = vector.shape_cast %27 : vector<1x8x384xf32> to vector<8x384xf32>
    %c0_31 = arith.constant 0 : index
    %c384 = arith.constant 384 : index
    %29 = vector.load %arg5[%c0_31, %c384] : memref<72x768xf32, #tpu.memory_space<vmem>>, vector<8x384xf32>
    tpu.vector_store %arg5[%c0_31, %c384], %28 {strides = array<i32>} : memref<72x768xf32, #tpu.memory_space<vmem>>, vector<8x384xf32>,
    %c1_32 = arith.constant 1 : index
    %c0_33 = arith.constant 0 : index
    %c1_34 = arith.constant 1 : index
    %30 = vector.load %arg1[%c1_32, %c0_33, %c1_34] : memref<2x8x422xf32, #tpu.memory_space<vmem>>, vector<1x8x384xf32>
    %31 = vector.shape_cast %30 : vector<1x8x384xf32> to vector<8x384xf32>
    %c8_35 = arith.constant 8 : index
    %c384_36 = arith.constant 384 : index
    %32 = vector.load %arg5[%c8_35, %c384_36] : memref<72x768xf32, #tpu.memory_space<vmem>>, vector<8x384xf32>
    tpu.vector_store %arg5[%c8_35, %c384_36], %31 {strides = array<i32>} : memref<72x768xf32, #tpu.memory_space<vmem>>, vector<8x384xf32>,
    %c1_37 = arith.constant 1 : index
    %c0_38 = arith.constant 0 : index
    %c2_39 = arith.constant 2 : index
    %33 = vector.load %arg1[%c1_37, %c0_38, %c2_39] : memref<2x8x422xf32, #tpu.memory_space<vmem>>, vector<1x8x384xf32>
    %34 = vector.shape_cast %33 : vector<1x8x384xf32> to vector<8x384xf32>
    %c16_40 = arith.constant 16 : index
    %c384_41 = arith.constant 384 : index
    %35 = vector.load %arg5[%c16_40, %c384_41] : memref<72x768xf32, #tpu.memory_space<vmem>>, vector<8x384xf32>
    tpu.vector_store %arg5[%c16_40, %c384_41], %34 {strides = array<i32>} : memref<72x768xf32, #tpu.memory_space<vmem>>, vector<8x384xf32>,
    %c1_42 = arith.constant 1 : index
    %c0_43 = arith.constant 0 : index
    %c18_44 = arith.constant 18 : index
    %36 = vector.load %arg1[%c1_42, %c0_43, %c18_44] : memref<2x8x422xf32, #tpu.memory_space<vmem>>, vector<1x8x384xf32>
    %37 = vector.shape_cast %36 : vector<1x8x384xf32> to vector<8x384xf32>
    %c24_45 = arith.constant 24 : index
    %c384_46 = arith.constant 384 : index
    %38 = vector.load %arg5[%c24_45, %c384_46] : memref<72x768xf32, #tpu.memory_space<vmem>>, vector<8x384xf32>
    tpu.vector_store %arg5[%c24_45, %c384_46], %37 {strides = array<i32>} : memref<72x768xf32, #tpu.memory_space<vmem>>, vector<8x384xf32>,
    %c1_47 = arith.constant 1 : index
    %c0_48 = arith.constant 0 : index
    %c19_49 = arith.constant 19 : index
    %39 = vector.load %arg1[%c1_47, %c0_48, %c19_49] : memref<2x8x422xf32, #tpu.memory_space<vmem>>, vector<1x8x384xf32>
    %40 = vector.shape_cast %39 : vector<1x8x384xf32> to vector<8x384xf32>
    %c32_50 = arith.constant 32 : index
    %c384_51 = arith.constant 384 : index
    %41 = vector.load %arg5[%c32_50, %c384_51] : memref<72x768xf32, #tpu.memory_space<vmem>>, vector<8x384xf32>
    tpu.vector_store %arg5[%c32_50, %c384_51], %40 {strides = array<i32>} : memref<72x768xf32, #tpu.memory_space<vmem>>, vector<8x384xf32>,
    %c1_52 = arith.constant 1 : index
    %c0_53 = arith.constant 0 : index
    %c20_54 = arith.constant 20 : index
    %42 = vector.load %arg1[%c1_52, %c0_53, %c20_54] : memref<2x8x422xf32, #tpu.memory_space<vmem>>, vector<1x8x384xf32>
    %43 = vector.shape_cast %42 : vector<1x8x384xf32> to vector<8x384xf32>
    %c40_55 = arith.constant 40 : index
    %c384_56 = arith.constant 384 : index
    %44 = vector.load %arg5[%c40_55, %c384_56] : memref<72x768xf32, #tpu.memory_space<vmem>>, vector<8x384xf32>
    tpu.vector_store %arg5[%c40_55, %c384_56], %43 {strides = array<i32>} : memref<72x768xf32, #tpu.memory_space<vmem>>, vector<8x384xf32>,
    %c1_57 = arith.constant 1 : index
    %c0_58 = arith.constant 0 : index
    %c36_59 = arith.constant 36 : index
    %45 = vector.load %arg1[%c1_57, %c0_58, %c36_59] : memref<2x8x422xf32, #tpu.memory_space<vmem>>, vector<1x8x384xf32>
    %46 = vector.shape_cast %45 : vector<1x8x384xf32> to vector<8x384xf32>
    %c48_60 = arith.constant 48 : index
    %c384_61 = arith.constant 384 : index
    %47 = vector.load %arg5[%c48_60, %c384_61] : memref<72x768xf32, #tpu.memory_space<vmem>>, vector<8x384xf32>
    tpu.vector_store %arg5[%c48_60, %c384_61], %46 {strides = array<i32>} : memref<72x768xf32, #tpu.memory_space<vmem>>, vector<8x384xf32>,
    %c1_62 = arith.constant 1 : index
    %c0_63 = arith.constant 0 : index
    %c37_64 = arith.constant 37 : index
    %48 = vector.load %arg1[%c1_62, %c0_63, %c37_64] : memref<2x8x422xf32, #tpu.memory_space<vmem>>, vector<1x8x384xf32>
    %49 = vector.shape_cast %48 : vector<1x8x384xf32> to vector<8x384xf32>
    %c56_65 = arith.constant 56 : index
    %c384_66 = arith.constant 384 : index
    %50 = vector.load %arg5[%c56_65, %c384_66] : memref<72x768xf32, #tpu.memory_space<vmem>>, vector<8x384xf32>
    tpu.vector_store %arg5[%c56_65, %c384_66], %49 {strides = array<i32>} : memref<72x768xf32, #tpu.memory_space<vmem>>, vector<8x384xf32>,
    %c1_67 = arith.constant 1 : index
    %c0_68 = arith.constant 0 : index
    %c38_69 = arith.constant 38 : index
    %51 = vector.load %arg1[%c1_67, %c0_68, %c38_69] : memref<2x8x422xf32, #tpu.memory_space<vmem>>, vector<1x8x384xf32>
    %52 = vector.shape_cast %51 : vector<1x8x384xf32> to vector<8x384xf32>
    %c64_70 = arith.constant 64 : index
    %c384_71 = arith.constant 384 : index
    %53 = vector.load %arg5[%c64_70, %c384_71] : memref<72x768xf32, #tpu.memory_space<vmem>>, vector<8x384xf32>
    tpu.vector_store %arg5[%c64_70, %c384_71], %52 {strides = array<i32>} : memref<72x768xf32, #tpu.memory_space<vmem>>, vector<8x384xf32>,
    %c0_72 = arith.constant 0 : index
    %c0_73 = arith.constant 0 : index
    %54 = vector.load %arg2[%c0_72, %c0_73] : memref<8x72xf32, #tpu.memory_space<vmem>>, vector<8x72xf32>
    %c0_74 = arith.constant 0 : index
    %c0_75 = arith.constant 0 : index
    %55 = vector.load %arg5[%c0_74, %c0_75] : memref<72x768xf32, #tpu.memory_space<vmem>>, vector<72x768xf32>
    %cst = arith.constant dense<0.000000e+00> : vector<8x768xf32>
    %56 = tpu.matmul %54, %55, %cst {dimension_numbers = #tpu.dot_dimension_numbers<[1], [0], [0], [1], [0, 0, 1, 1], [], []>} : vector<8x72xf32>, vector<72x768xf32>, vector<8x768xf32> -> vector<8x768xf32>
    %c0_76 = arith.constant 0 : index
    %c0_77 = arith.constant 0 : index
    %57 = vector.load %arg3[%c0_76, %c0_77] : memref<8x1xf32, #tpu.memory_space<vmem>>, vector<8x1xf32>
    %58 = vector.broadcast %57 : vector<8x1xf32> to vector<8x768xf32>
    %59 = arith.addf %56, %58 : vector<8x768xf32>
    %60 = vector.extract_strided_slice %59 {offsets = [0, 0], sizes = [8, 384], strides = [1, 1]} : vector<8x768xf32> to vector<8x384xf32>
    %c0_78 = arith.constant 0 : index
    %c0_79 = arith.constant 0 : index
    %c0_80 = arith.constant 0 : index
    %61 = vector.load %arg4[%c0_78, %c0_79, %c0_80] : memref<2x8x384xf32, #tpu.memory_space<vmem>>, vector<1x8x384xf32>
    %62 = vector.shape_cast %61 : vector<1x8x384xf32> to vector<8x384xf32>
    %63 = vector.shape_cast %60 : vector<8x384xf32> to vector<1x8x384xf32>
    tpu.vector_store %arg4[%c0_78, %c0_79, %c0_80], %63 {strides = array<i32>} : memref<2x8x384xf32, #tpu.memory_space<vmem>>, vector<1x8x384xf32>,
    %64 = vector.extract_strided_slice %59 {offsets = [0, 384], sizes = [8, 384], strides = [1, 1]} : vector<8x768xf32> to vector<8x384xf32>
    %c1_81 = arith.constant 1 : index
    %c0_82 = arith.constant 0 : index
    %c0_83 = arith.constant 0 : index
    %65 = vector.load %arg4[%c1_81, %c0_82, %c0_83] : memref<2x8x384xf32, #tpu.memory_space<vmem>>, vector<1x8x384xf32>
    %66 = vector.shape_cast %65 : vector<1x8x384xf32> to vector<8x384xf32>
    %67 = vector.shape_cast %64 : vector<8x384xf32> to vector<1x8x384xf32>
    tpu.vector_store %arg4[%c1_81, %c0_82, %c0_83], %67 {strides = array<i32>} : memref<2x8x384xf32, #tpu.memory_space<vmem>>, vector<1x8x384xf32>,
    return
  }
  func.func @transform_0(%arg0: i32) -> (i32, i32, i32) {
    %c0_i32 = arith.constant 0 : i32
    %c0_i32_0 = arith.constant 0 : i32
    %c0_i32_1 = arith.constant 0 : i32
    return %arg0, %c0_i32, %c0_i32_0 : i32, i32, i32
  }
  func.func @transform_1(%arg0: i32) -> (i32, i32) {
    %c0_i32 = arith.constant 0 : i32
    %c0_i32_0 = arith.constant 0 : i32
    %c0_i32_1 = arith.constant 0 : i32
    return %c0_i32, %c0_i32_0 : i32, i32
  }
  func.func @transform_2(%arg0: i32) -> (i32, i32) {
    %c0_i32 = arith.constant 0 : i32
    %c0_i32_0 = arith.constant 0 : i32
    %c0_i32_1 = arith.constant 0 : i32
    return %c0_i32, %c0_i32_0 : i32, i32
  }
  func.func @transform_3(%arg0: i32) -> (i32, i32, i32) {
    %c0_i32 = arith.constant 0 : i32
    %c0_i32_0 = arith.constant 0 : i32
    %c0_i32_1 = arith.constant 0 : i32
    return %arg0, %c0_i32, %c0_i32_0 : i32, i32, i32
  }
}

</mosaic_0001>

<bundles_post_ra>
// kernel: tpu_custom_call.1
= control target key start
LH: loop header
LB: loop body
LE: loop exit
PB: predicated region body
PF: predicated region fallthrough
CT: control target
= control target key end

     0   :  { %8 = vsyncpa [#allocation4], 0  ;;  %s1115_s0 = inlined_call_operand.hbm [shape: f32[2,8,422], index: 0, kind: input, shape index: {}]   ;;  %s1116_s1 = inlined_call_operand.vmem [shape: f32[8,72], index: 1, kind: input, shape index: {}]   ;;  %s1117_s2 = inlined_call_operand.vmem [shape: f32[8,1], index: 2, kind: input, shape index: {}]   ;;  %s1118_s3 = inlined_call_operand.hbm [shape: f32[2,8,384], index: 3, kind: output, shape index: {}]  }
   0x1   :  { %9 = vsyncpa [#allocation5], 0  ;;  %s14_s14 = sshll.u32 %s1115_s0, 4  ;;  %s898_s15 = smov [#allocation3]   ;;  %s15_s14 = int_to_ptr.hbm [resolvable:$true] %s14_s14 }
   0x2   :  { %s16_s16 = sshll.u32 %s898_s15, 4  ;;  %s899_s17 = smov 512   ;;  %s17_s16 = int_to_ptr.vmem [resolvable:$true] %s16_s16 }
   0x3   :  { %s900_s18 = smov 32  }
   0x4   :  { %22 = dma.hbm_to_vmem [thread:$0]  %s15_s14, 1024, %s17_s16, [#allocation4], %s899_s17, %s899_s17, %s900_s18  }
   0x5   :  { %894 = dma.done.wait [#allocation4], 1024  }
   0x6   :  { %895 = vsyncadd [#allocation4], 4294966272  ;;  %v936_v0 = vld [vmem:[#allocation3 + $0x10] sm:$0xff]  ;;  %v222_v1 = vld [vmem:[#allocation3 + $0x18] sm:$0xff]  ;;  %s901_s0 = smov 90   ;;  %s902_s19 = smov 91  }
   0x7   :  { %v938_v2 = vld [vmem:[#allocation3] sm:$0xff]  ;;  %v694_v3 = vpack.i.bf16 %v222_v1, %v936_v0  ;;  %v941_v4 = vld [vmem:[#allocation3 + $0x8] sm:$0xff]  ;;  %s903_s20 = smov 127   ;;  %s904_s21 = smov 92   ;;  %v955_v9 = vld [vmem:[#allocation3 + $0x30] sm:$0xff]  ;;  %vm235_vm0 = vcmask 736256  }
   0x8   :  { %v684_v5 = vpack.i.bf16 %v941_v4, %v938_v2  ;;  %v947_v6 = vld [vmem:[#allocation3 + $0x20] sm:$0xff]  ;;  %v949_v7 = vld [vmem:[#allocation3 + $0x28] sm:$0xff]  ;;  %s905_s22 = smov 108   ;;  %s906_s23 = smov 109   ;;  %v430_v10 = vld [vmem:[#allocation3 + $0x38] sm:$0xff]  ;;  %vm209_vm1 = vcmask 744448  }
   0x9   :  { %695 = vrot.lane.b32.xlu1 %v694_v3, %s901_s0  ;;  %705 = vrot.lane.b32.xlu2 %v694_v3, %s902_s19  ;;  %v709_v8 = vpack.i.bf16 %v949_v7, %v947_v6  ;;  %v759_v11 = vpack.i.bf16 %v430_v10, %v955_v9  ;;  %s907_s24 = smov 110   ;;  %s908_s25 = smov 126   ;;  %vm183_vm2 = vcmask 752640   ;;  %vm157_vm3 = vcmask 883712  }
   0xa   :  { %685 = vrot.lane.b32.xlu0 %v684_v5, %s903_s20  ;;  %vm131_vm4 = vcmask 891904   ;;  %vm105_vm5 = vcmask 900096   ;;  %vm79_vm6 = vcmask 1031168   ;;  %vm53_vm7 = vcmask 1039360   ;;  %s650_s5 = sshll.u32 %s1118_s3, 4  ;;  %s911_s6 = smov 384   ;;  %s651_s5 = int_to_ptr.hbm [resolvable:$true] %s650_s5 }
   0xb   :  { %vm513_vm8 = vcmask 588800   ;;  %s912_s7 = smov 24  }
  0x11   :  { %710 = vrot.lane.b32.xlu2 %v709_v8, %s901_s0  ;;  %700 = vrot.lane.b32.xlu1 %v684_v5, %s902_s19 }
  0x12   :  { %690 = vrot.lane.b32.xlu0 %v684_v5, %s901_s0 }
  0x19   :  { %725 = vrot.lane.b32.xlu2 %v709_v8, %s902_s19  ;;  %720 = vrot.lane.b32.xlu1 %v694_v3, %s904_s21 }
  0x1a   :  { %715 = vrot.lane.b32.xlu0 %v684_v5, %s904_s21 }
  0x21   :  { %740 = vrot.lane.b32.xlu2 %v709_v8, %s904_s21  ;;  %735 = vrot.lane.b32.xlu1 %v694_v3, %s905_s22 }
  0x22   :  { %730 = vrot.lane.b32.xlu0 %v684_v5, %s905_s22 }
  0x29   :  { %755 = vrot.lane.b32.xlu2 %v709_v8, %s905_s22  ;;  %750 = vrot.lane.b32.xlu1 %v694_v3, %s906_s23 }
  0x2a   :  { %745 = vrot.lane.b32.xlu0 %v684_v5, %s906_s23 }
  0x31   :  { %770 = vrot.lane.b32.xlu2 %v694_v3, %s907_s24  ;;  %765 = vrot.lane.b32.xlu1 %v684_v5, %s907_s24 }
  0x32   :  { %760 = vrot.lane.b32.xlu0 %v759_v11, %s901_s0 }
  0x39   :  { %780 = vrot.lane.b32.xlu1 %v759_v11, %s902_s19  ;;  %785 = vrot.lane.b32.xlu2 %v684_v5, %s908_s25 }
  0x3a   :  { %775 = vrot.lane.b32.xlu0 %v709_v8, %s906_s23 }
  0x41   :  { %795 = vrot.lane.b32.xlu1 %v709_v8, %s907_s24  ;;  %800 = vrot.lane.b32.xlu2 %v759_v11, %s904_s21 }
  0x42   :  { %790 = vrot.lane.b32.xlu0 %v694_v3, %s908_s25 }
  0x49   :  { %810 = vrot.lane.b32.xlu1 %v709_v8, %s908_s25  ;;  %815 = vrot.lane.b32.xlu2 %v759_v11, %s905_s22 }
  0x4a   :  { %805 = vrot.lane.b32.xlu0 %v694_v3, %s903_s20 }
  0x51   :  { %825 = vrot.lane.b32.xlu1 %v759_v11, %s906_s23  ;;  %830 = vrot.lane.b32.xlu2 %v759_v11, %s907_s24 }
  0x52   :  { %820 = vrot.lane.b32.xlu0 %v709_v8, %s903_s20 }
  0x59   :  { %840 = vrot.lane.b32.xlu1 %v759_v11, %s903_s20 }
  0x5a   :  { %835 = vrot.lane.b32.xlu0 %v759_v11, %s908_s25 }
  0x63   :  { %v706_v12 = vpop.permute.xlu2 %705 }
  0x64   :  { %v708_v21 = vunpack.i.h.bf16 %v706_v12  ;;  %v707_v22 = vunpack.i.l.bf16 %v706_v12 }
  0x66   :  { %v212_v31 = vsel %vm209_vm1, %v707_v22, %v708_v21 }
  0x6b   :  { %v962_v13 = vpop.permute.xlu2 %710 }
  0x6c   :  { %v713_v14 = vunpack.i.h.bf16 %v962_v13  ;;  %v712_v15 = vunpack.i.l.bf16 %v962_v13 }
  0x6e   :  { %v443_v16 = vsel %vm235_vm0, %v712_v15, %v713_v14 }
  0x6f   :  { %584 = vmatpush.msra.mxu3 %v443_v16 }
  0x73   :  { %v969_v17 = vpop.permute.xlu2 %725 }
  0x74   :  { %v728_v18 = vunpack.i.h.bf16 %v969_v17  ;;  %v727_v19 = vunpack.i.l.bf16 %v969_v17 }
  0x76   :  { %v418_v20 = vsel %vm209_vm1, %v727_v19, %v728_v18 }
  0x77   :  { %585 = vmatpush.msra.mxu3 %v418_v20 }
  0x7b   :  { %v696_v23 = vpop.permute.xlu1 %695  ;;  %v976_v24 = vpop.permute.xlu2 %740 }
  0x7c   :  { %v698_v25 = vunpack.i.h.bf16 %v696_v23  ;;  %v697_v26 = vunpack.i.l.bf16 %v696_v23  ;;  %v743_v27 = vunpack.i.h.bf16 %v976_v24  ;;  %v742_v28 = vunpack.i.l.bf16 %v976_v24  ;;  %v980_v29 = vpop.permute.xlu0 %685  ;;  %v507_v24 = vld [vmem:[%s1117_s2] sm:$0xff]  ;;  %s910_s2 = smov [#allocation6]  }
  0x7d   :  { %s648_s29 = sshll.u32 %s910_s2, 4  ;;  %s649_s29 = int_to_ptr.vmem [resolvable:$true] %s648_s29 }
  0x7e   :  { %v238_v30 = vsel %vm235_vm0, %v697_v26, %v698_v25  ;;  %v393_v32 = vsel %vm183_vm2, %v742_v28, %v743_v27 }
  0x7f   :  { %564 = vmatpush.msra.mxu2 %v238_v30  ;;  %586 = vmatpush.msra.mxu3 %v393_v32 }
  0x81   :  { %565 = vmatpush.msra.mxu2 %v212_v31 }
  0x83   :  { %v987_v33 = vpop.permute.xlu2 %755  ;;  %v701_v34 = vpop.permute.xlu1 %700 }
  0x84   :  { %v758_v35 = vunpack.i.h.bf16 %v987_v33  ;;  %v757_v36 = vunpack.i.l.bf16 %v987_v33  ;;  %v702_v37 = vunpack.i.l.bf16 %v701_v34  ;;  %v691_v38 = vpop.permute.xlu0 %690  ;;  %v703_v39 = vunpack.i.h.bf16 %v701_v34 }
  0x85   :  { %v693_v40 = vunpack.i.h.bf16 %v691_v38  ;;  %v692_v41 = vunpack.i.l.bf16 %v691_v38  ;;  %v687_v38 = vunpack.i.l.bf16 %v980_v29 }
  0x86   :  { %v368_v42 = vsel %vm157_vm3, %v757_v36, %v758_v35  ;;  %v210_v45 = vsel %vm209_vm1, %v702_v37, %v703_v39  ;;  %v211_v46 = vsel %vm209_vm1, %v703_v39, %v707_v22  ;;  %v688_v37 = vunpack.i.h.bf16 %v980_v29 }
  0x87   :  { %v236_v43 = vsel %vm235_vm0, %v692_v41, %v693_v40  ;;  %v237_v44 = vsel %vm235_vm0, %v693_v40, %v697_v26  ;;  %587 = vmatpush.msra.mxu3 %v368_v42 }
  0x88   :  { %524 = vmatpush.msra.mxu0 %v236_v43  ;;  %544 = vmatpush.msra.mxu1 %v237_v44  ;;  %v54_v43 = vsel %vm53_vm7, %v687_v38, %v688_v37 }
  0x8a   :  { %525 = vmatpush.msra.mxu0 %v210_v45  ;;  %545 = vmatpush.msra.mxu1 %v211_v46 }
  0x8b   :  { %v721_v47 = vpop.permute.xlu1 %720  ;;  %v771_v53 = vpop.permute.xlu2 %770 }
  0x8c   :  { %v723_v48 = vunpack.i.h.bf16 %v721_v47  ;;  %v722_v49 = vunpack.i.l.bf16 %v721_v47  ;;  %v716_v50 = vpop.permute.xlu0 %715  ;;  %v773_v8 = vunpack.i.h.bf16 %v771_v53  ;;  %v772_v11 = vunpack.i.l.bf16 %v771_v53 }
  0x8d   :  { %v718_v51 = vunpack.i.h.bf16 %v716_v50  ;;  %v717_v52 = vunpack.i.l.bf16 %v716_v50 }
  0x8e   :  { %v186_v54 = vsel %vm183_vm2, %v722_v49, %v723_v48  ;;  %v108_v22 = vsel %vm105_vm5, %v772_v11, %v773_v8  ;;  %v1034_v48 = vld [vmem:[%s1116_s1] sm:$0xff] }
  0x8f   :  { %v184_v55 = vsel %vm183_vm2, %v717_v52, %v718_v51  ;;  %v185_v56 = vsel %vm183_vm2, %v718_v51, %v722_v49  ;;  %566 = vmatpush.msra.mxu2 %v186_v54 }
  0x90   :  { %526 = vmatpush.msra.mxu0 %v184_v55  ;;  %546 = vmatpush.msra.mxu1 %v185_v56 }
  0x93   :  { %v736_v57 = vpop.permute.xlu1 %735  ;;  %v1004_v5 = vpop.permute.xlu2 %785 }
  0x94   :  { %v738_v58 = vunpack.i.h.bf16 %v736_v57  ;;  %v737_v59 = vunpack.i.l.bf16 %v736_v57  ;;  %v731_v60 = vpop.permute.xlu0 %730  ;;  %v788_v26 = vunpack.i.h.bf16 %v1004_v5  ;;  %v787_v28 = vunpack.i.l.bf16 %v1004_v5 }
  0x95   :  { %v733_v61 = vunpack.i.h.bf16 %v731_v60  ;;  %v732_v62 = vunpack.i.l.bf16 %v731_v60 }
  0x96   :  { %v160_v63 = vsel %vm157_vm3, %v737_v59, %v738_v58  ;;  %v80_v40 = vsel %vm79_vm6, %v787_v28, %v788_v26  ;;  %v909_v58 = vmov 0  }
  0x97   :  { %v158_v1 = vsel %vm157_vm3, %v732_v62, %v733_v61  ;;  %v159_v3 = vsel %vm157_vm3, %v733_v61, %v737_v59  ;;  %567 = vmatpush.msra.mxu2 %v160_v63  ;;  %844 = vset.pattern.permute.xlu2 %v909_v58 }
  0x98   :  { %527 = vmatpush.msra.mxu0 %v158_v1  ;;  %547 = vmatpush.msra.mxu1 %v159_v3 }
  0x99   :  { %845 = vset.pattern.permute.xlu0 %v909_v58  ;;  %510 = vperm.xlu2 %844, %v507_v24  }
  0x9b   :  { %v751_v10 = vpop.permute.xlu1 %750  ;;  %v1012_v30 = vpop.permute.xlu2 %800 }
  0x9c   :  { %v753_v12 = vunpack.i.h.bf16 %v751_v10  ;;  %v752_v15 = vunpack.i.l.bf16 %v751_v10  ;;  %v746_v16 = vpop.permute.xlu0 %745  ;;  %v802_v45 = vunpack.i.l.bf16 %v1012_v30 }
  0x9d   :  { %v748_v19 = vunpack.i.h.bf16 %v746_v16  ;;  %v747_v20 = vunpack.i.l.bf16 %v746_v16 }
  0x9e   :  { %v134_v21 = vsel %vm131_vm4, %v752_v15, %v753_v12 }
  0x9f   :  { %v132_v23 = vsel %vm131_vm4, %v747_v20, %v748_v19  ;;  %v133_v25 = vsel %vm131_vm4, %v748_v19, %v752_v15  ;;  %568 = vmatpush.msra.mxu2 %v134_v21  ;;  %v803_v15 = vunpack.i.h.bf16 %v1012_v30 }
  0xa0   :  { %528 = vmatpush.msra.mxu0 %v132_v23  ;;  %548 = vmatpush.msra.mxu1 %v133_v25 }
  0xa1   :  { %569 = vmatpush.msra.mxu2 %v108_v22 }
  0xa3   :  { %v766_v31 = vpop.permute.xlu1 %765  ;;  %v1026_v29 = vpop.permute.xlu2 %815 }
  0xa4   :  { %v768_v32 = vunpack.i.h.bf16 %v766_v31  ;;  %v767_v34 = vunpack.i.l.bf16 %v766_v31  ;;  %v1014_v36 = vpop.permute.xlu0 %760  ;;  %v817_v53 = vunpack.i.l.bf16 %v1026_v29  ;;  %v818_v19 = vunpack.i.h.bf16 %v1026_v29 }
  0xa5   :  { %v762_v42 = vunpack.i.l.bf16 %v1014_v36  ;;  %v763_v3 = vunpack.i.h.bf16 %v1014_v36  ;;  %v395_v31 = vsel %vm183_vm2, %v802_v45, %v803_v15 }
  0xa6   :  { %v106_v39 = vsel %vm105_vm5, %v767_v34, %v768_v32  ;;  %v107_v41 = vsel %vm105_vm5, %v768_v32, %v772_v11  ;;  %v370_v36 = vsel %vm157_vm3, %v817_v53, %v818_v19 }
  0xa7   :  { %529 = vmatpush.msra.mxu0 %v106_v39  ;;  %549 = vmatpush.msra.mxu1 %v107_v41  ;;  %v444_v51 = vsel %vm235_vm0, %v713_v14, %v762_v42  ;;  %v369_v14 = vsel %vm157_vm3, %v758_v35, %v817_v53  ;;  %v445_v16 = vsel %vm235_vm0, %v762_v42, %v763_v3 }
  0xa9   :  { %530 = vmatpush.msra.mxu0 %v80_v40 }
  0xab   :  { %v1023_v44 = vpop.permute.xlu1 %780  ;;  %531 = vmatpush.msra.mxu0 %v54_v43  ;;  %v831_v12 = vpop.permute.xlu2 %830 }
  0xac   :  { %v782_v46 = vunpack.i.l.bf16 %v1023_v44  ;;  %v1029_v47 = vpop.permute.xlu0 %775  ;;  %v783_v11 = vunpack.i.h.bf16 %v1023_v44  ;;  %v832_v21 = vunpack.i.l.bf16 %v831_v12  ;;  %v833_v28 = vunpack.i.h.bf16 %v831_v12 }
  0xad   :  { %v778_v49 = vunpack.i.h.bf16 %v1029_v47  ;;  %v777_v50 = vunpack.i.l.bf16 %v1029_v47  ;;  %532 = vmatpush.msra.mxu0 %v938_v2  ;;  %v394_v2 = vsel %vm183_vm2, %v743_v27, %v802_v45 }
  0xae   :  { %v419_v52 = vsel %vm209_vm1, %v728_v18, %v782_v46  ;;  %663 = vmatmul.msk.f32.vlgmr.msra.gmra.mxu0 %vm513_vm8, %v1034_v48  ;;  %v320_v30 = vsel %vm105_vm5, %v832_v21, %v833_v28 }
  0xaf   :  { %604 = vmatpush.msrb.mxu0 %v444_v51  ;;  %v343_v54 = vsel %vm131_vm4, %v777_v50, %v778_v49 }
  0xb0   :  { %588 = vmatpush.msra.mxu3 %v343_v54 }
  0xb1   :  { %605 = vmatpush.msrb.mxu0 %v419_v52 }
  0xb3   :  { %606 = vmatpush.msrb.mxu0 %v394_v2  ;;  %v796_v13 = vpop.permute.xlu1 %795 }
  0xb4   :  { %v798_v17 = vunpack.i.h.bf16 %v796_v13  ;;  %v797_v18 = vunpack.i.l.bf16 %v796_v13  ;;  %v791_v55 = vpop.permute.xlu0 %790 }
  0xb5   :  { %607 = vmatpush.msrb.mxu0 %v369_v14  ;;  %v793_v56 = vunpack.i.h.bf16 %v791_v55  ;;  %v792_v57 = vunpack.i.l.bf16 %v791_v55 }
  0xb6   :  { %v318_v27 = vsel %vm105_vm5, %v797_v18, %v798_v17 }
  0xb7   :  { %v81_v59 = vsel %vm79_vm6, %v788_v26, %v792_v57  ;;  %v82_v33 = vsel %vm79_vm6, %v792_v57, %v793_v56  ;;  %589 = vmatpush.msra.mxu3 %v318_v27  ;;  %v420_v26 = vsel %vm209_vm1, %v782_v46, %v783_v11 }
  0xb8   :  { %550 = vmatpush.msra.mxu1 %v81_v59  ;;  %570 = vmatpush.msra.mxu2 %v82_v33 }
  0xbb   :  { %v811_v35 = vpop.permute.xlu1 %810 }
  0xbc   :  { %v813_v60 = vunpack.i.h.bf16 %v811_v35  ;;  %v812_v61 = vunpack.i.l.bf16 %v811_v35  ;;  %v806_v62 = vpop.permute.xlu0 %805 }
  0xbd   :  { %v808_v63 = vunpack.i.h.bf16 %v806_v62  ;;  %v807_v1 = vunpack.i.l.bf16 %v806_v62 }
  0xbe   :  { %v293_v5 = vsel %vm79_vm6, %v812_v61, %v813_v60 }
  0xbf   :  { %v55_v8 = vsel %vm53_vm7, %v688_v37, %v807_v1  ;;  %v56_v10 = vsel %vm53_vm7, %v807_v1, %v808_v63  ;;  %590 = vmatpush.msra.mxu3 %v293_v5  ;;  %v319_v37 = vsel %vm105_vm5, %v798_v17, %v832_v21 }
  0xc0   :  { %551 = vmatpush.msra.mxu1 %v55_v8  ;;  %571 = vmatpush.msra.mxu2 %v56_v10 }
  0xc2   :  { %552 = vmatpush.msra.mxu1 %v941_v4  ;;  %572 = vmatpush.msra.mxu2 %v936_v0 }
  0xc3   :  { %v826_v20 = vpop.permute.xlu1 %825  ;;  %665 = vmatmul.msk.f32.vlgmr.msra.gmra.mxu2 %vm513_vm8, %v1034_v48  ;;  %664 = vmatmul.msk.f32.vlgmr.msra.gmra.mxu1 %vm513_vm8, %v1034_v48 }
  0xc4   :  { %624 = vmatpush.msrb.mxu1 %v445_v16  ;;  %v828_v22 = vunpack.i.h.bf16 %v826_v20  ;;  %v827_v23 = vunpack.i.l.bf16 %v826_v20  ;;  %v821_v25 = vpop.permute.xlu0 %820 }
  0xc5   :  { %v823_v4 = vunpack.i.h.bf16 %v821_v25  ;;  %v822_v0 = vunpack.i.l.bf16 %v821_v25 }
  0xc6   :  { %625 = vmatpush.msrb.mxu1 %v420_v26  ;;  %v344_v32 = vsel %vm131_vm4, %v778_v49, %v827_v23  ;;  %v345_v38 = vsel %vm131_vm4, %v827_v23, %v828_v22 }
  0xc7   :  { %v268_v34 = vsel %vm53_vm7, %v822_v0, %v823_v4  ;;  %608 = vmatpush.msrb.mxu0 %v344_v32 }
  0xc8   :  { %626 = vmatpush.msrb.mxu1 %v395_v31  ;;  %591 = vmatpush.msra.mxu3 %v268_v34 }
  0xc9   :  { %609 = vmatpush.msrb.mxu0 %v319_v37 }
  0xca   :  { %627 = vmatpush.msrb.mxu1 %v370_v36  ;;  %592 = vmatpush.msra.mxu3 %v947_v6 }
  0xcb   :  { %v841_v39 = vpop.permute.xlu1 %840  ;;  %666 = vmatmul.msk.f32.vlgmr.msra.gmra.mxu3 %vm513_vm8, %v1034_v48 }
  0xcc   :  { %628 = vmatpush.msrb.mxu1 %v345_v38  ;;  %v843_v40 = vunpack.i.h.bf16 %v841_v39  ;;  %v836_v41 = vpop.permute.xlu0 %835  ;;  %v842_v42 = vunpack.i.l.bf16 %v841_v39 }
  0xcd   :  { %v838_v43 = vunpack.i.h.bf16 %v836_v41  ;;  %v837_v44 = vunpack.i.l.bf16 %v836_v41 }
  0xce   :  { %629 = vmatpush.msrb.mxu1 %v320_v30  ;;  %v270_v46 = vsel %vm53_vm7, %v842_v42, %v843_v40  ;;  %v269_v6 = vsel %vm53_vm7, %v823_v4, %v842_v42 }
  0xcf   :  { %v294_v45 = vsel %vm79_vm6, %v813_v60, %v837_v44  ;;  %v295_v29 = vsel %vm79_vm6, %v837_v44, %v838_v43 }
  0xd0   :  { %610 = vmatpush.msrb.mxu0 %v294_v45  ;;  %630 = vmatpush.msrb.mxu1 %v295_v29 }
  0xd2   :  { %611 = vmatpush.msrb.mxu0 %v269_v6  ;;  %631 = vmatpush.msrb.mxu1 %v270_v46 }
  0xd4   :  { %612 = vmatpush.msrb.mxu0 %v949_v7  ;;  %632 = vmatpush.msrb.mxu1 %v955_v9 }
  0xd5   :  { %667 = vmatmul.msk.f32.vlgmr.msrb.gmra.mxu0 %vm513_vm8, %v1034_v48  ;;  %668 = vmatmul.msk.f32.vlgmr.msrb.gmra.mxu1 %vm513_vm8, %v1034_v48 }
  0xf3   :  { %v511_v47 = vpop.permute.xlu2 %510 }
 0x12b   :  { %v534_v49 = vpop.f32.mrf.mxu0 }
 0x12c   :  { %v535_v50 = vadd.f32 %v534_v49, %v511_v47 }
 0x12e   :  { %637 = vst [vmem:[#allocation6] sm:$0xff] %v535_v50 }
 0x140   :  { %v554_v51 = vpop.f32.mrf.mxu1 }
 0x141   :  { %v555_v52 = vadd.f32 %v554_v51, %v511_v47 }
 0x143   :  { %638 = vst [vmem:[#allocation6 + $0x8] sm:$0xff] %v555_v52 }
 0x146   :  { %v574_v53 = vpop.f32.mrf.mxu2 }
 0x147   :  { %v575_v54 = vadd.f32 %v574_v53, %v511_v47 }
 0x149   :  { %639 = vst [vmem:[#allocation6 + $0x10] sm:$0xff] %v575_v54 }
 0x14e   :  { %v594_v2 = vpop.f32.mrf.mxu3 }
 0x14f   :  { %v595_v7 = vadd.f32 %v594_v2, %v511_v47 }
 0x151   :  { %641 = vst [vmem:[#allocation6 + $0x18] sm:$0xff] %v595_v7 }
 0x152   :  { %v614_v9 = vpop.f32.mrf.mxu0  ;;  %v634_v48 = vpop.f32.mrf.mxu1 }
 0x153   :  { %v615_v13 = vadd.f32 %v614_v9, %v511_v47  ;;  %v635_v14 = vadd.f32 %v634_v48, %v511_v47 }
 0x155   :  { %642 = vst [vmem:[#allocation6 + $0x20] sm:$0xff] %v615_v13 }
 0x156   :  { %643 = vst [vmem:[#allocation6 + $0x28] sm:$0xff] %v635_v14 }
 0x157   :  { %656 = dma.vmem_to_hbm [thread:$0]  %s649_s29, 768, %s651_s5, [#allocation5], %s911_s6, %s911_s6, %s912_s7  }
 0x158   :  { %896 = dma.done.wait [#allocation5], 768  }
 0x159   :  { %897 = vsyncadd [#allocation5], 4294966528 }
 0x15a   :  { %661 = vsyncpa [#allocation4], 1 }
 0x15b   :  { %662 = vsyncpa [#allocation5], 1 }

</bundles_post_ra>
